<compile_context>
chip_gen: v7x
topology: tpu7x:2x2x1
jax: 0.10.0
libtpu: 0.0.40
codegen_flags: <defaults>
</compile_context>

<pallas_src>
import functools
import math

import jax
import jax.numpy as jnp
from jax import lax
from jax.experimental import pallas as pl
from jax.experimental.pallas import tpu as pltpu


def _round_up(v, m):
    return (v + m - 1) // m * m


def _pick_tile(n_pad, cap, unit=256):
    """Largest multiple of `unit` that divides n_pad and is <= cap (>= unit)."""
    m = n_pad // unit
    cap_units = max(1, min(cap // unit, m))
    best = 1
    for d in range(1, cap_units + 1):
        if m % d == 0:
            best = d
    return best * unit


# ---------------------------------------------------------------------------
# Deterministic counter-based dropout mask (shared by kernel and reference).
# ---------------------------------------------------------------------------
_MIX1 = 0x9E3779B1
_MIX2 = 0x7FEB352D
_MIX3 = 0x846CA68B


def _hash_keep_mask(rows, cols, n_cols, seed, drop_p):
    """Per-element keep mask with P(keep) = 1 - drop_p.

    rows/cols are int32 arrays (broadcastable) of GLOBAL element coordinates,
    so the mask depends only on element position + seed, never on which grid
    tile touches the element.
    """
    idx = (rows * n_cols + cols).astype(jnp.uint32)
    h = idx * jnp.uint32(_MIX1) + jnp.uint32(seed & 0xFFFFFFFF)
    h = h ^ (h >> jnp.uint32(16))
    h = h * jnp.uint32(_MIX2)
    h = h ^ (h >> jnp.uint32(15))
    h = h * jnp.uint32(_MIX3)
    h = h ^ (h >> jnp.uint32(16))
    # Top 23 bits as non-negative int32 -> cheap signed integer threshold compare.
    val = (h >> jnp.uint32(9)).astype(jnp.int32)
    thresh = int(drop_p * (1 << 23))
    return val >= thresh


# ---------------------------------------------------------------------------
# Kernel (a): XW staging  ->  out = (mask? x) @ W + b     (per row tile)
#   The dropout 1/(1-p) scale is pre-folded into W in the wrapper, so the
#   kernel only does a select.  W / bias use constant index_maps (resident).
# ---------------------------------------------------------------------------
def _stage_xw_kernel(x_ref, w_ref, b_ref, o_ref, *, block_m, n_cols, drop_p,
                     seed):
    xk = x_ref[...]
    if drop_p > 0.0:
        i = pl.program_id(0)
        rows = lax.broadcasted_iota(jnp.int32, xk.shape, 0) + i * block_m
        cols = lax.broadcasted_iota(jnp.int32, xk.shape, 1)
        keep = _hash_keep_mask(rows, cols, n_cols, seed, drop_p)
        xk = jnp.where(keep, xk, jnp.zeros_like(xk))
    acc = jnp.dot(xk, w_ref[...], preferred_element_type=jnp.float32)
    acc = acc + b_ref[...].astype(jnp.float32)
    o_ref[...] = acc.astype(o_ref.dtype)


def _stage_xw(xp, wp, bp, *, block_m, drop_p=0.0, seed=0):
    n_pad, c_pad = xp.shape
    h_pad = wp.shape[1]
    kernel = functools.partial(
        _stage_xw_kernel, block_m=block_m, n_cols=c_pad,
        drop_p=float(drop_p), seed=int(seed))
    return pl.pallas_call(
        kernel,
        out_shape=jax.ShapeDtypeStruct((n_pad, h_pad), xp.dtype),
        grid_spec=pltpu.PrefetchScalarGridSpec(
            num_scalar_prefetch=0,
            grid=(n_pad // block_m,),
            in_specs=[
                pl.BlockSpec((block_m, c_pad), lambda i: (i, 0)),   # x rows
                pl.BlockSpec((c_pad, h_pad), lambda i: (0, 0)),     # W (resident)
                pl.BlockSpec((1, h_pad), lambda i: (0, 0)),         # bias (resident)
            ],
            out_specs=pl.BlockSpec((block_m, h_pad), lambda i: (i, 0)),
        ),
        compiler_params=pltpu.CompilerParams(
            dimension_semantics=("parallel",),
            vmem_limit_bytes=48 * 1024 * 1024,
        ),
    )(xp, wp, bp)


# ---------------------------------------------------------------------------
# Kernel (b): out = relu(G @ XW), tiled over (row tiles, k tiles) with an f32
#             VMEM accumulator (output is stored in compute dtype).
# ---------------------------------------------------------------------------
def _g_matmul_relu_kernel(g_ref, xw_ref, o_ref, acc_ref):
    k = pl.program_id(1)

    @pl.when(k == 0)
    def _init():
        acc_ref[...] = jnp.zeros_like(acc_ref)

    acc_ref[...] += jnp.dot(g_ref[...], xw_ref[...],
                            preferred_element_type=jnp.float32)

    @pl.when(k == pl.num_programs(1) - 1)
    def _finish():
        o_ref[...] = jnp.maximum(acc_ref[...], 0.0).astype(o_ref.dtype)


def _g_matmul_relu(gp, xwp, *, bm, bk):
    n_pad = gp.shape[0]
    h_pad = xwp.shape[1]
    return pl.pallas_call(
        _g_matmul_relu_kernel,
        out_shape=jax.ShapeDtypeStruct((n_pad, h_pad), xwp.dtype),
        grid_spec=pltpu.PrefetchScalarGridSpec(
            num_scalar_prefetch=0,
            grid=(n_pad // bm, n_pad // bk),
            in_specs=[
                pl.BlockSpec((bm, bk), lambda i, k: (i, k)),        # G tile
                pl.BlockSpec((bk, h_pad), lambda i, k: (k, 0)),     # XW k-rows
            ],
            out_specs=pl.BlockSpec((bm, h_pad), lambda i, k: (i, 0)),
            scratch_shapes=[pltpu.VMEM((bm, h_pad), jnp.float32)],
        ),
        compiler_params=pltpu.CompilerParams(
            dimension_semantics=("parallel", "arbitrary"),
            vmem_limit_bytes=48 * 1024 * 1024,
        ),
    )(gp, xwp)


# ---------------------------------------------------------------------------
# HGNN_embedding: parameters + forward
# ---------------------------------------------------------------------------
def init_hgnn_embedding_params(key, in_ch, n_hid):
    """Mimics HGNN_conv.reset_parameters: uniform(-stdv, stdv), stdv = 1/sqrt(out_ft)."""
    k1, k2, k3, k4 = jax.random.split(key, 4)
    stdv = 1.0 / math.sqrt(n_hid)
    return {
        "w1": jax.random.uniform(k1, (in_ch, n_hid), jnp.float32, -stdv, stdv),
        "b1": jax.random.uniform(k2, (n_hid,), jnp.float32, -stdv, stdv),
        "w2": jax.random.uniform(k3, (n_hid, n_hid), jnp.float32, -stdv, stdv),
        "b2": jax.random.uniform(k4, (n_hid,), jnp.float32, -stdv, stdv),
    }


def hgnn_embedding_forward(params, x, g, *, dropout_p=0.5, dropout_seed=0,
                           training=True, block_n=512,
                           compute_dtype=jnp.bfloat16):
    """relu(G @ (relu(G @ (x W1 + b1)) [dropout] W2 + b2)), returned as f32.

    NB: the PyTorch module uses F.dropout(x, p) with its default training=True,
    so dropout is applied; pass training=False here to skip the mask.
    block_n=512 is v7x-VMEM-safe; on v5e/v6e (128 MiB VMEM) block_n=1024 is fine.
    """
    n, c = x.shape
    n_hid = params["w1"].shape[1]
    p = float(dropout_p) if training else 0.0
    cd = compute_dtype

    n_pad = _round_up(n, 256)
    c_pad = _round_up(c, 128)
    h_pad = _round_up(n_hid, 128)

    # Tile sizes: divisors of n_pad (no rounding N up to block_n).  Row tile is
    # capped at n_pad/2 when possible so >=2 "parallel" tiles exist (v7x 2 TCs).
    bk = _pick_tile(n_pad, block_n)
    row_cap = block_n if n_pad < 512 else min(block_n, n_pad // 2)
    bm = _pick_tile(n_pad, row_cap)
    bx = _pick_tile(n_pad, block_n)

    # Cast to compute dtype FIRST, then zero-pad (no f32 padded copies in HBM).
    # G is padded/cast ONCE and reused by both layers.
    gp = jnp.pad(g.astype(cd), ((0, n_pad - n), (0, n_pad - n)))
    xp = jnp.pad(x.astype(cd), ((0, n_pad - n), (0, c_pad - c)))

    w1p = jnp.pad(params["w1"].astype(cd),
                  ((0, c_pad - c), (0, h_pad - n_hid)))
    b1p = jnp.pad(params["b1"].astype(jnp.float32).reshape(1, -1),
                  ((0, 0), (0, h_pad - n_hid)))
    # Fold the dropout 1/(1-p) scale into W2: (mask*h1/(1-p)) @ W2 == (mask*h1) @ (W2/(1-p)).
    w2 = params["w2"] * (1.0 / (1.0 - p)) if p > 0.0 else params["w2"]
    w2p = jnp.pad(w2.astype(cd), ((0, h_pad - n_hid), (0, h_pad - n_hid)))
    b2p = jnp.pad(params["b2"].astype(jnp.float32).reshape(1, -1),
                  ((0, 0), (0, h_pad - n_hid)))

    # Layer 1: h1 = relu(G @ (x W1 + b1)).  Padded region of h1 stays exactly 0.
    xw1 = _stage_xw(xp, w1p, b1p, block_m=bx)
    h1p = _g_matmul_relu(gp, xw1, bm=bm, bk=bk)

    # Layer 2: h2 = relu(G @ (dropout(h1) W2 + b2)); mask applied once in staging.
    xw2 = _stage_xw(h1p, w2p, b2p, block_m=bx, drop_p=p, seed=dropout_seed)
    h2p = _g_matmul_relu(gp, xw2, bm=bm, bk=bk)

    return h2p[:n, :n_hid].astype(jnp.float32)


def hgnn_embedding_reference(params, x, g, *, drop_p, seed):
    """Pure-JAX reference with the identical dropout mask (for validation)."""
    n_hid = params["w1"].shape[1]
    h_pad = _round_up(n_hid, 128)   # column stride the kernel hashes with
    h1 = jax.nn.relu(g @ (x @ params["w1"] + params["b1"]))
    if drop_p > 0.0:
        rows = jnp.arange(h1.shape[0], dtype=jnp.int32)[:, None]
        cols = jnp.arange(h1.shape[1], dtype=jnp.int32)[None, :]
        keep = _hash_keep_mask(rows, cols, h_pad, seed, drop_p)
        h1 = jnp.where(keep, h1 * (1.0 / (1.0 - drop_p)), 0.0)
    return jax.nn.relu(g @ (h1 @ params["w2"] + params["b2"]))


if __name__ == "__main__":
    DROP_P, SEED = 0.5, 1234
    key = jax.random.PRNGKey(0)

    # --- Case 1: small shapes (row pad 200->256, lane pad 96->128), 1x1 grid.
    N1, IN1, HID1 = 200, 96, 128
    k1, k2, k3, key = jax.random.split(key, 4)
    x1 = jax.random.normal(k1, (N1, IN1), dtype=jnp.float32)
    G1 = jax.random.normal(k2, (N1, N1), dtype=jnp.float32)
    p1 = init_hgnn_embedding_params(k3, IN1, HID1)

    out1 = hgnn_embedding_forward(p1, x1, G1, dropout_p=DROP_P,
                                  dropout_seed=SEED,
                                  compute_dtype=jnp.float32)
    out1 = jax.block_until_ready(out1)
    ref1 = hgnn_embedding_reference(p1, x1, G1, drop_p=DROP_P, seed=SEED)
    assert out1.shape == (N1, HID1)
    err1 = float(jnp.max(jnp.abs(out1 - ref1)))
    tol1 = 1e-2 * (1.0 + float(jnp.max(jnp.abs(ref1))))
    assert err1 < tol1, f"case1 max abs err {err1} > {tol1}"

    # --- Case 2: multi-tile grid (600 -> n_pad=768, 3x3 accumulation grid),
    #             exercises k-accumulation, column padding, and dropout tiling.
    N2, IN2, HID2 = 600, 200, 96
    k1, k2, k3, key = jax.random.split(key, 4)
    x2 = jax.random.normal(k1, (N2, IN2), dtype=jnp.float32)
    G2 = jax.random.normal(k2, (N2, N2), dtype=jnp.float32) * 0.05
    p2 = init_hgnn_embedding_params(k3, IN2, HID2)

    out2 = hgnn_embedding_forward(p2, x2, G2, dropout_p=DROP_P,
                                  dropout_seed=SEED, block_n=512,
                                  compute_dtype=jnp.float32)
    out2 = jax.block_until_ready(out2)
    ref2 = hgnn_embedding_reference(p2, x2, G2, drop_p=DROP_P, seed=SEED)
    assert out2.shape == (N2, HID2)
    err2 = float(jnp.max(jnp.abs(out2 - ref2)))
    tol2 = 1e-2 * (1.0 + float(jnp.max(jnp.abs(ref2))))
    assert err2 < tol2, f"case2 max abs err {err2} > {tol2}"

    # --- Default fast path: bf16 operands in HBM, f32 MXU accumulation.
    out_fast = hgnn_embedding_forward(p1, x1, G1, dropout_p=DROP_P,
                                      dropout_seed=SEED)
    out_fast = jax.block_until_ready(out_fast)
    assert out_fast.shape == (N1, HID1)
    assert bool(jnp.all(out_fast >= 0.0))   # final ReLU guarantees non-negativity

    print("KERNEL_OK")
</pallas_src>

<mosaic_0001>
module attributes {stable_mosaic.version = 11 : i64} {
  func.func @_stage_xw_kernel(%arg0: i32, %arg1: memref<256x128xf32, #tpu.memory_space<vmem>>, %arg2: memref<128x128xf32, #tpu.memory_space<vmem>>, %arg3: memref<1x128xf32, #tpu.memory_space<vmem>>, %arg4: memref<256x128xf32, #tpu.memory_space<vmem>>) attributes {dimension_semantics = [#tpu.dimension_semantics<parallel>], iteration_bounds = array<i64: 1>, scalar_prefetch = 0 : i64, scratch_operands = 0 : i64, tpu.core_type = #tpu.core_type<tc>, window_params = [{transform_indices = @transform_0, window_bounds = array<i64: 256, 128>}, {pipeline_mode = #tpu.pipeline_mode<synchronous>, transform_indices = @transform_1, window_bounds = array<i64: 128, 128>}, {pipeline_mode = #tpu.pipeline_mode<synchronous>, transform_indices = @transform_2, window_bounds = array<i64: 1, 128>}, {transform_indices = @transform_3, window_bounds = array<i64: 256, 128>}]} {
    %c0 = arith.constant 0 : index
    %c0_0 = arith.constant 0 : index
    %0 = vector.load %arg1[%c0, %c0_0] : memref<256x128xf32, #tpu.memory_space<vmem>>, vector<256x128xf32>
    %c0_1 = arith.constant 0 : index
    %c0_2 = arith.constant 0 : index
    %1 = vector.load %arg2[%c0_1, %c0_2] : memref<128x128xf32, #tpu.memory_space<vmem>>, vector<128x128xf32>
    %cst = arith.constant dense<0.000000e+00> : vector<256x128xf32>
    %2 = tpu.matmul %0, %1, %cst {dimension_numbers = #tpu.dot_dimension_numbers<[1], [0], [0], [1], [0, 0, 1, 1], [], []>} : vector<256x128xf32>, vector<128x128xf32>, vector<256x128xf32> -> vector<256x128xf32>
    %c0_3 = arith.constant 0 : index
    %c0_4 = arith.constant 0 : index
    %3 = vector.load %arg3[%c0_3, %c0_4] : memref<1x128xf32, #tpu.memory_space<vmem>>, vector<1x128xf32>
    %4 = vector.broadcast %3 : vector<1x128xf32> to vector<256x128xf32>
    %5 = arith.addf %2, %4 : vector<256x128xf32>
    %c0_5 = arith.constant 0 : index
    %c0_6 = arith.constant 0 : index
    %6 = vector.load %arg4[%c0_5, %c0_6] : memref<256x128xf32, #tpu.memory_space<vmem>>, vector<256x128xf32>
    tpu.vector_store %arg4[%c0_5, %c0_6], %5 {strides = array<i32>} : memref<256x128xf32, #tpu.memory_space<vmem>>, vector<256x128xf32>,
    return
  }
  func.func @transform_0(%arg0: i32) -> (i32, i32) {
    %c0_i32 = arith.constant 0 : i32
    %c0_i32_0 = arith.constant 0 : i32
    return %arg0, %c0_i32 : i32, i32
  }
  func.func @transform_1(%arg0: i32) -> (i32, i32) {
    %c0_i32 = arith.constant 0 : i32
    %c0_i32_0 = arith.constant 0 : i32
    %c0_i32_1 = arith.constant 0 : i32
    return %c0_i32, %c0_i32_0 : i32, i32
  }
  func.func @transform_2(%arg0: i32) -> (i32, i32) {
    %c0_i32 = arith.constant 0 : i32
    %c0_i32_0 = arith.constant 0 : i32
    %c0_i32_1 = arith.constant 0 : i32
    return %c0_i32, %c0_i32_0 : i32, i32
  }
  func.func @transform_3(%arg0: i32) -> (i32, i32) {
    %c0_i32 = arith.constant 0 : i32
    %c0_i32_0 = arith.constant 0 : i32
    return %arg0, %c0_i32 : i32, i32
  }
}

</mosaic_0001>

<bundles_post_ra>
// kernel: tpu_custom_call.1
= control target key start
LH: loop header
LB: loop body
LE: loop exit
PB: predicated region body
PF: predicated region fallthrough
CT: control target
= control target key end

     0   :  { %8 = vsyncpa [#allocation3], 0  ;;  %s734_s0 = inlined_call_operand.hbm [shape: f32[256,128], index: 0, kind: input, shape index: {}]   ;;  %s735_s1 = inlined_call_operand.hbm [shape: f32[128,128], index: 1, kind: input, shape index: {}]   ;;  %s736_s2 = inlined_call_operand.vmem [shape: f32[1,128], index: 2, kind: input, shape index: {}]   ;;  %s737_s3 = inlined_call_operand.hbm [shape: f32[256,128], index: 3, kind: output, shape index: {}]  }
   0x1   :  { %9 = vsyncpa [#allocation6], 0 }
   0x2   :  { %10 = vsyncpa [#allocation4], 0  ;;  %s627_s12 = smov [#allocation2]   ;;  %s555_s16 = scalar_lea.hbm %s734_s0, 4096 }
   0x3   :  { %s16_s13 = sshll.u32 %s627_s12, 4  ;;  %p556_p0 = scmp.ne.s32.totalorder %s734_s0, %s555_s16  ;;  %s17_s13 = int_to_ptr.vmem [resolvable:$true] %s16_s13 }
   0x4   :  { %p559_p1 = scmp.lt.u32.totalorder %s555_s16, %s734_s0 }
   0x6   :  { %p561_p2 = pnand %p559_p1, %p556_p0 }
   0x8   :  { %564 = shalt.err (!%p561_p2)
}
   0x9   :  { %s565_s21 = scalar_lea.vmem %s17_s13, 4096  ;;  %p570_p4 = scmp.lt.s32.totalorder %s17_s13, %s17_s13 }
   0xa   :  { %p566_p3 = scmp.ne.s32.totalorder %s17_s13, %s565_s21  ;;  %p571_p5 = scmp.lt.s32.totalorder %s565_s21, %s565_s21 }
   0xc   :  { %p572_p6 = por %p571_p5, %p570_p4 }
   0xe   :  { %p573_p7 = pnand %p572_p6, %p566_p3 }
  0x10   :  { %576 = shalt.err (!%p573_p7)
}
  0x11   :  { %s628_s22 = smov 128   ;;  %s629_s23 = smov 8  }
  0x12   :  { %22 = dma.hbm_to_vmem [thread:$0]  %s734_s0, 4096, %s17_s13, [#allocation3], %s628_s22, %s628_s22, %s629_s23  }
  0x13   :  { %s630_s26 = smov [#allocation5]   ;;  %s577_s30 = scalar_lea.hbm %s735_s1, 2048 }
  0x14   :  { %s28_s27 = sshll.u32 %s630_s26, 4  ;;  %p578_p8 = scmp.ne.s32.totalorder %s735_s1, %s577_s30  ;;  %s29_s27 = int_to_ptr.vmem [resolvable:$true] %s28_s27 }
  0x15   :  { %p581_p9 = scmp.lt.u32.totalorder %s577_s30, %s735_s1 }
  0x17   :  { %p583_p10 = pnand %p581_p9, %p578_p8 }
  0x19   :  { %586 = shalt.err (!%p583_p10)
}
  0x1a   :  { %s587_s8 = scalar_lea.vmem %s29_s27, 2048  ;;  %p592_p12 = scmp.lt.s32.totalorder %s29_s27, %s29_s27 }
  0x1b   :  { %p588_p11 = scmp.ne.s32.totalorder %s29_s27, %s587_s8  ;;  %p593_p13 = scmp.lt.s32.totalorder %s587_s8, %s587_s8 }
  0x1d   :  { %p594_p0 = por %p593_p13, %p592_p12 }
  0x1f   :  { %p595_p1 = pnand %p594_p0, %p588_p11 }
  0x21   :  { %598 = shalt.err (!%p595_p1)
}
  0x22   :  { %34 = dma.hbm_to_vmem [thread:$0]  %s735_s1, 2048, %s29_s27, [#allocation6], %s628_s22, %s628_s22, %s629_s23  }
  0x23   :  { %621 = dma.done.wait [#allocation3], 4096  }
  0x24   :  { %622 = vsyncadd [#allocation3], 4294963200 }
  0x25   :  { %623 = dma.done.wait [#allocation6], 2048  }
  0x26   :  { %624 = vsyncadd [#allocation6], 4294965248  ;;  %v75_v0 = vld [vmem:[#allocation5] sm:$0xff]  ;;  %v76_v1 = vld [vmem:[#allocation5 + $0x8] sm:$0xff] }
  0x27   :  { %v77_v2 = vld [vmem:[#allocation5 + $0x10] sm:$0xff]  ;;  %v502_v3 = vpack.c.bf16 %v76_v1, %v75_v0  ;;  %v78_v4 = vld [vmem:[#allocation5 + $0x18] sm:$0xff]  ;;  %v79_v6 = vld [vmem:[#allocation5 + $0x20] sm:$0xff] }
  0x28   :  { %v506_v5 = vpack.c.bf16 %v78_v4, %v77_v2  ;;  %v80_v7 = vld [vmem:[#allocation5 + $0x28] sm:$0xff]  ;;  %v43_v9 = vld [vmem:[#allocation2] sm:$0xff]  ;;  %v81_v11 = vld [vmem:[#allocation5 + $0x30] sm:$0xff] }
  0x29   :  { %503 = vmatprep.subr.bf16.mxu0 %v502_v3  ;;  %534 = vmatprep.subr.bf16.mxu1 %v502_v3  ;;  %v510_v8 = vpack.c.bf16 %v80_v7, %v79_v6  ;;  %v59_v10 = vld [vmem:[#allocation2 + $0x80] sm:$0xff]  ;;  %v82_v12 = vld [vmem:[#allocation5 + $0x38] sm:$0xff]  ;;  %v84_v15 = vld [vmem:[#allocation5 + $0x48] sm:$0xff] }
  0x2a   :  { %505 = vmatpush3.bf16.msra.mxu0 %v502_v3  ;;  %542 = vmatpush3.bf16.msra.mxu1 %v502_v3  ;;  %v514_v13 = vpack.c.bf16 %v82_v12, %v81_v11  ;;  %v83_v14 = vld [vmem:[#allocation5 + $0x40] sm:$0xff]  ;;  %v85_v17 = vld [vmem:[#allocation5 + $0x50] sm:$0xff]  ;;  %v86_v18 = vld [vmem:[#allocation5 + $0x58] sm:$0xff] }
  0x2b   :  { %507 = vmatprep.subr.bf16.mxu0 %v506_v5  ;;  %535 = vmatprep.subr.bf16.mxu1 %v506_v5  ;;  %v518_v16 = vpack.c.bf16 %v84_v15, %v83_v14  ;;  %v522_v19 = vpack.c.bf16 %v86_v18, %v85_v17  ;;  %v87_v20 = vld [vmem:[#allocation5 + $0x60] sm:$0xff]  ;;  %v88_v21 = vld [vmem:[#allocation5 + $0x68] sm:$0xff]  ;;  %v89_v23 = vld [vmem:[#allocation5 + $0x70] sm:$0xff] }
  0x2c   :  { %454 = vmatprep.mubr.f32.mxu0 %v43_v9  ;;  %478 = vmatprep.mubr.f32.mxu1 %v59_v10  ;;  %v526_v22 = vpack.c.bf16 %v88_v21, %v87_v20  ;;  %v90_v24 = vld [vmem:[#allocation5 + $0x78] sm:$0xff]  ;;  %v44_v26 = vld [vmem:[#allocation2 + $0x8] sm:$0xff]  ;;  %v45_v28 = vld [vmem:[#allocation2 + $0x10] sm:$0xff] }
  0x2d   :  { %v530_v25 = vpack.c.bf16 %v90_v24, %v89_v23  ;;  %v60_v27 = vld [vmem:[#allocation2 + $0x88] sm:$0xff]  ;;  %v61_v29 = vld [vmem:[#allocation2 + $0x90] sm:$0xff]  ;;  %v46_v30 = vld [vmem:[#allocation2 + $0x18] sm:$0xff] }
  0x2e   :  { %509 = vmatpush3.bf16.msra.mxu0 %v506_v5  ;;  %543 = vmatpush3.bf16.msra.mxu1 %v506_v5  ;;  %v62_v31 = vld [vmem:[#allocation2 + $0x98] sm:$0xff]  ;;  %v47_v32 = vld [vmem:[#allocation2 + $0x20] sm:$0xff]  ;;  %v48_v34 = vld [vmem:[#allocation2 + $0x28] sm:$0xff] }
  0x2f   :  { %511 = vmatprep.subr.bf16.mxu0 %v510_v8  ;;  %536 = vmatprep.subr.bf16.mxu1 %v510_v8  ;;  %v63_v33 = vld [vmem:[#allocation2 + $0xa0] sm:$0xff]  ;;  %v64_v35 = vld [vmem:[#allocation2 + $0xa8] sm:$0xff]  ;;  %v49_v36 = vld [vmem:[#allocation2 + $0x30] sm:$0xff] }
  0x30   :  { %v65_v37 = vld [vmem:[#allocation2 + $0xb0] sm:$0xff]  ;;  %v50_v38 = vld [vmem:[#allocation2 + $0x38] sm:$0xff]  ;;  %v51_v40 = vld [vmem:[#allocation2 + $0x40] sm:$0xff] }
  0x31   :  { %v66_v39 = vld [vmem:[#allocation2 + $0xb8] sm:$0xff]  ;;  %v67_v41 = vld [vmem:[#allocation2 + $0xc0] sm:$0xff]  ;;  %v52_v42 = vld [vmem:[#allocation2 + $0x48] sm:$0xff] }
  0x32   :  { %513 = vmatpush3.bf16.msra.mxu0 %v510_v8  ;;  %544 = vmatpush3.bf16.msra.mxu1 %v510_v8  ;;  %v68_v43 = vld [vmem:[#allocation2 + $0xc8] sm:$0xff]  ;;  %v53_v44 = vld [vmem:[#allocation2 + $0x50] sm:$0xff]  ;;  %v54_v46 = vld [vmem:[#allocation2 + $0x58] sm:$0xff] }
  0x33   :  { %515 = vmatprep.subr.bf16.mxu0 %v514_v13  ;;  %537 = vmatprep.subr.bf16.mxu1 %v514_v13  ;;  %v69_v45 = vld [vmem:[#allocation2 + $0xd0] sm:$0xff]  ;;  %v70_v47 = vld [vmem:[#allocation2 + $0xd8] sm:$0xff]  ;;  %v55_v48 = vld [vmem:[#allocation2 + $0x60] sm:$0xff] }
  0x34   :  { %v71_v49 = vld [vmem:[#allocation2 + $0xe0] sm:$0xff]  ;;  %v56_v50 = vld [vmem:[#allocation2 + $0x68] sm:$0xff]  ;;  %v57_v52 = vld [vmem:[#allocation2 + $0x70] sm:$0xff] }
  0x35   :  { %v72_v51 = vld [vmem:[#allocation2 + $0xe8] sm:$0xff]  ;;  %v73_v53 = vld [vmem:[#allocation2 + $0xf0] sm:$0xff]  ;;  %v58_v54 = vld [vmem:[#allocation2 + $0x78] sm:$0xff] }
  0x36   :  { %517 = vmatpush3.bf16.msra.mxu0 %v514_v13  ;;  %545 = vmatpush3.bf16.msra.mxu1 %v514_v13  ;;  %v74_v55 = vld [vmem:[#allocation2 + $0xf8] sm:$0xff]  ;;  %v685_v56 = vld [vmem:[%s736_s2] ss:$0 sm:$0xff]  ;;  %s631_s2 = smov [#allocation7]  }
  0x37   :  { %519 = vmatprep.subr.bf16.mxu0 %v518_v16  ;;  %538 = vmatprep.subr.bf16.mxu1 %v518_v16  ;;  %s360_s11 = sshll.u32 %s631_s2, 4  ;;  %s361_s11 = int_to_ptr.vmem [resolvable:$true] %s360_s11 }
  0x38   :  { %s599_s12 = scalar_lea.vmem %s361_s11, 4096  ;;  %p604_p3 = scmp.lt.s32.totalorder %s361_s11, %s361_s11 }
  0x39   :  { %p600_p2 = scmp.ne.s32.totalorder %s361_s11, %s599_s12  ;;  %p605_p4 = scmp.lt.s32.totalorder %s599_s12, %s599_s12 }
  0x3a   :  { %521 = vmatpush3.bf16.msra.mxu0 %v518_v16  ;;  %546 = vmatpush3.bf16.msra.mxu1 %v518_v16 }
  0x3b   :  { %523 = vmatprep.subr.bf16.mxu0 %v522_v19  ;;  %539 = vmatprep.subr.bf16.mxu1 %v522_v19  ;;  %p606_p5 = por %p605_p4, %p604_p3 }
  0x3d   :  { %p607_p6 = pnand %p606_p5, %p600_p2 }
  0x3e   :  { %525 = vmatpush3.bf16.msra.mxu0 %v522_v19  ;;  %547 = vmatpush3.bf16.msra.mxu1 %v522_v19 }
  0x3f   :  { %527 = vmatprep.subr.bf16.mxu0 %v526_v22  ;;  %540 = vmatprep.subr.bf16.mxu1 %v526_v22 }
  0x42   :  { %529 = vmatpush3.bf16.msra.mxu0 %v526_v22  ;;  %548 = vmatpush3.bf16.msra.mxu1 %v526_v22 }
  0x43   :  { %531 = vmatprep.subr.bf16.mxu0 %v530_v25  ;;  %541 = vmatprep.subr.bf16.mxu1 %v530_v25 }
  0x46   :  { %533 = vmatpush3.bf16.msra.mxu0 %v530_v25  ;;  %549 = vmatpush3.bf16.msra.mxu1 %v530_v25 }
  0x49   :  { %455 = vmatmul.mubr.f32.vlgmr.msra.gmra.mrb[0].mxu0 %v44_v26  ;;  %479 = vmatmul.mubr.f32.vlgmr.msra.gmra.mrb[0].mxu1 %v60_v27 }
  0x4a   :  { %457 = vmatprep.mubr.f32.mxu0 %v45_v28  ;;  %481 = vmatprep.mubr.f32.mxu1 %v61_v29 }
  0x4d   :  { %458 = vmatmul.mubr.f32.gmra.mrb[2].mxu0 %v46_v30  ;;  %482 = vmatmul.mubr.f32.gmra.mrb[2].mxu1 %v62_v31 }
  0x4e   :  { %460 = vmatprep.mubr.f32.mxu0 %v47_v32  ;;  %484 = vmatprep.mubr.f32.mxu1 %v63_v33 }
  0x51   :  { %461 = vmatmul.mubr.f32.gmra.mrb[4].mxu0 %v48_v34  ;;  %485 = vmatmul.mubr.f32.gmra.mrb[4].mxu1 %v64_v35 }
  0x52   :  { %463 = vmatprep.mubr.f32.mxu0 %v49_v36  ;;  %487 = vmatprep.mubr.f32.mxu1 %v65_v37 }
  0x55   :  { %464 = vmatmul.mubr.f32.gmra.mrb[6].mxu0 %v50_v38  ;;  %488 = vmatmul.mubr.f32.gmra.mrb[6].mxu1 %v66_v39 }
  0x56   :  { %466 = vmatprep.mubr.f32.mxu0 %v51_v40  ;;  %490 = vmatprep.mubr.f32.mxu1 %v67_v41 }
  0x59   :  { %467 = vmatmul.mubr.f32.gmra.mrb[8].mxu0 %v52_v42  ;;  %491 = vmatmul.mubr.f32.gmra.mrb[8].mxu1 %v68_v43 }
  0x5a   :  { %469 = vmatprep.mubr.f32.mxu0 %v53_v44  ;;  %493 = vmatprep.mubr.f32.mxu1 %v69_v45 }
  0x5d   :  { %470 = vmatmul.mubr.f32.gmra.mrb[10].mxu0 %v54_v46  ;;  %494 = vmatmul.mubr.f32.gmra.mrb[10].mxu1 %v70_v47 }
  0x5e   :  { %472 = vmatprep.mubr.f32.mxu0 %v55_v48  ;;  %496 = vmatprep.mubr.f32.mxu1 %v71_v49 }
  0x61   :  { %473 = vmatmul.mubr.f32.gmra.mrb[12].mxu0 %v56_v50  ;;  %497 = vmatmul.mubr.f32.gmra.mrb[12].mxu1 %v72_v51 }
  0x62   :  { %475 = vmatprep.mubr.f32.mxu0 %v57_v52  ;;  %499 = vmatprep.mubr.f32.mxu1 %v73_v53 }
  0x65   :  { %476 = vmatmul.mubr.f32.gmra.mrb[14].mxu0 %v58_v54  ;;  %500 = vmatmul.mubr.f32.gmra.mrb[14].mxu1 %v74_v55 }
 0x11c   :  { %v456_v57 = vpop.f32.mrb[0].mxu0  ;;  %v480_v58 = vpop.f32.mrb[0].mxu1 }
 0x11d   :  { %v170_v59 = vadd.f32 %v456_v57, %v685_v56  ;;  %v250_v60 = vadd.f32 %v480_v58, %v685_v56  ;;  %v164_v61 = vpop.f32.mrb[1].mxu0  ;;  %v244_v62 = vpop.f32.mrb[1].mxu1 }
 0x11e   :  { %v165_v63 = vadd.f32 %v685_v56, %v164_v61  ;;  %v245_v0 = vadd.f32 %v685_v56, %v244_v62 }
 0x11f   :  { %324 = vst [vmem:[#allocation7 + $0x8] sm:$0xff] %v170_v59  ;;  %340 = vst [vmem:[#allocation7 + $0x88] sm:$0xff] %v250_v60 }
 0x120   :  { %323 = vst [vmem:[#allocation7] sm:$0xff] %v165_v63  ;;  %339 = vst [vmem:[#allocation7 + $0x80] sm:$0xff] %v245_v0  ;;  %v459_v1 = vpop.f32.mrb[2].mxu0  ;;  %v483_v2 = vpop.f32.mrb[2].mxu1 }
 0x121   :  { %v180_v3 = vadd.f32 %v459_v1, %v685_v56  ;;  %v260_v4 = vadd.f32 %v483_v2, %v685_v56  ;;  %v174_v5 = vpop.f32.mrb[3].mxu0  ;;  %v254_v6 = vpop.f32.mrb[3].mxu1 }
 0x122   :  { %v175_v7 = vadd.f32 %v685_v56, %v174_v5  ;;  %v255_v8 = vadd.f32 %v685_v56, %v254_v6 }
 0x123   :  { %326 = vst [vmem:[#allocation7 + $0x18] sm:$0xff] %v180_v3  ;;  %342 = vst [vmem:[#allocation7 + $0x98] sm:$0xff] %v260_v4 }
 0x124   :  { %325 = vst [vmem:[#allocation7 + $0x10] sm:$0xff] %v175_v7  ;;  %341 = vst [vmem:[#allocation7 + $0x90] sm:$0xff] %v255_v8  ;;  %v462_v9 = vpop.f32.mrb[4].mxu0  ;;  %v486_v10 = vpop.f32.mrb[4].mxu1 }
 0x125   :  { %v190_v11 = vadd.f32 %v462_v9, %v685_v56  ;;  %v270_v12 = vadd.f32 %v486_v10, %v685_v56  ;;  %v184_v13 = vpop.f32.mrb[5].mxu0  ;;  %v264_v14 = vpop.f32.mrb[5].mxu1 }
 0x126   :  { %v185_v15 = vadd.f32 %v685_v56, %v184_v13  ;;  %v265_v16 = vadd.f32 %v685_v56, %v264_v14 }
 0x127   :  { %328 = vst [vmem:[#allocation7 + $0x28] sm:$0xff] %v190_v11  ;;  %344 = vst [vmem:[#allocation7 + $0xa8] sm:$0xff] %v270_v12 }
 0x128   :  { %327 = vst [vmem:[#allocation7 + $0x20] sm:$0xff] %v185_v15  ;;  %343 = vst [vmem:[#allocation7 + $0xa0] sm:$0xff] %v265_v16  ;;  %v465_v17 = vpop.f32.mrb[6].mxu0  ;;  %v489_v18 = vpop.f32.mrb[6].mxu1 }
 0x129   :  { %v200_v19 = vadd.f32 %v465_v17, %v685_v56  ;;  %v280_v20 = vadd.f32 %v489_v18, %v685_v56  ;;  %v194_v21 = vpop.f32.mrb[7].mxu0  ;;  %v274_v22 = vpop.f32.mrb[7].mxu1 }
 0x12a   :  { %v195_v23 = vadd.f32 %v685_v56, %v194_v21  ;;  %v275_v24 = vadd.f32 %v685_v56, %v274_v22 }
 0x12b   :  { %330 = vst [vmem:[#allocation7 + $0x38] sm:$0xff] %v200_v19  ;;  %346 = vst [vmem:[#allocation7 + $0xb8] sm:$0xff] %v280_v20 }
 0x12c   :  { %329 = vst [vmem:[#allocation7 + $0x30] sm:$0xff] %v195_v23  ;;  %345 = vst [vmem:[#allocation7 + $0xb0] sm:$0xff] %v275_v24  ;;  %v468_v25 = vpop.f32.mrb[8].mxu0  ;;  %v492_v26 = vpop.f32.mrb[8].mxu1 }
 0x12d   :  { %v210_v27 = vadd.f32 %v468_v25, %v685_v56  ;;  %v290_v28 = vadd.f32 %v492_v26, %v685_v56  ;;  %v204_v29 = vpop.f32.mrb[9].mxu0  ;;  %v284_v30 = vpop.f32.mrb[9].mxu1 }
 0x12e   :  { %v205_v31 = vadd.f32 %v685_v56, %v204_v29  ;;  %v285_v32 = vadd.f32 %v685_v56, %v284_v30 }
 0x12f   :  { %332 = vst [vmem:[#allocation7 + $0x48] sm:$0xff] %v210_v27  ;;  %348 = vst [vmem:[#allocation7 + $0xc8] sm:$0xff] %v290_v28 }
 0x130   :  { %331 = vst [vmem:[#allocation7 + $0x40] sm:$0xff] %v205_v31  ;;  %347 = vst [vmem:[#allocation7 + $0xc0] sm:$0xff] %v285_v32  ;;  %v471_v33 = vpop.f32.mrb[10].mxu0  ;;  %v495_v34 = vpop.f32.mrb[10].mxu1 }
 0x131   :  { %v220_v35 = vadd.f32 %v471_v33, %v685_v56  ;;  %v300_v36 = vadd.f32 %v495_v34, %v685_v56  ;;  %v214_v37 = vpop.f32.mrb[11].mxu0  ;;  %v294_v38 = vpop.f32.mrb[11].mxu1 }
 0x132   :  { %v215_v39 = vadd.f32 %v685_v56, %v214_v37  ;;  %v295_v40 = vadd.f32 %v685_v56, %v294_v38 }
 0x133   :  { %334 = vst [vmem:[#allocation7 + $0x58] sm:$0xff] %v220_v35  ;;  %350 = vst [vmem:[#allocation7 + $0xd8] sm:$0xff] %v300_v36 }
 0x134   :  { %333 = vst [vmem:[#allocation7 + $0x50] sm:$0xff] %v215_v39  ;;  %349 = vst [vmem:[#allocation7 + $0xd0] sm:$0xff] %v295_v40  ;;  %v474_v41 = vpop.f32.mrb[12].mxu0  ;;  %v498_v42 = vpop.f32.mrb[12].mxu1 }
 0x135   :  { %v230_v43 = vadd.f32 %v474_v41, %v685_v56  ;;  %v310_v44 = vadd.f32 %v498_v42, %v685_v56  ;;  %v224_v45 = vpop.f32.mrb[13].mxu0  ;;  %v304_v46 = vpop.f32.mrb[13].mxu1 }
 0x136   :  { %v225_v47 = vadd.f32 %v685_v56, %v224_v45  ;;  %v305_v48 = vadd.f32 %v685_v56, %v304_v46 }
 0x137   :  { %336 = vst [vmem:[#allocation7 + $0x68] sm:$0xff] %v230_v43  ;;  %352 = vst [vmem:[#allocation7 + $0xe8] sm:$0xff] %v310_v44 }
 0x138   :  { %335 = vst [vmem:[#allocation7 + $0x60] sm:$0xff] %v225_v47  ;;  %351 = vst [vmem:[#allocation7 + $0xe0] sm:$0xff] %v305_v48  ;;  %v477_v49 = vpop.f32.mrb[14].mxu0  ;;  %v501_v50 = vpop.f32.mrb[14].mxu1 }
 0x139   :  { %v240_v51 = vadd.f32 %v477_v49, %v685_v56  ;;  %v320_v52 = vadd.f32 %v501_v50, %v685_v56  ;;  %v234_v53 = vpop.f32.mrb[15].mxu0  ;;  %v314_v54 = vpop.f32.mrb[15].mxu1 }
 0x13a   :  { %v235_v55 = vadd.f32 %v685_v56, %v234_v53  ;;  %v315_v57 = vadd.f32 %v685_v56, %v314_v54 }
 0x13b   :  { %338 = vst [vmem:[#allocation7 + $0x78] sm:$0xff] %v240_v51  ;;  %354 = vst [vmem:[#allocation7 + $0xf8] sm:$0xff] %v320_v52 }
 0x13c   :  { %337 = vst [vmem:[#allocation7 + $0x70] sm:$0xff] %v235_v55  ;;  %353 = vst [vmem:[#allocation7 + $0xf0] sm:$0xff] %v315_v57 }
 0x13d   :  { %610 = shalt.err (!%p607_p6)
}
 0x13e   :  { %s611_s15 = scalar_lea.hbm %s737_s3, 4096 }
 0x13f   :  { %p612_p7 = scmp.ne.s32.totalorder %s737_s3, %s611_s15  ;;  %p615_p8 = scmp.lt.u32.totalorder %s611_s15, %s737_s3 }
 0x141   :  { %p617_p9 = pnand %p615_p8, %p612_p7 }
 0x143   :  { %620 = shalt.err (!%p617_p9)
}
 0x144   :  { %366 = dma.vmem_to_hbm [thread:$0]  %s361_s11, 4096, %s737_s3, [#allocation4], %s628_s22, %s628_s22, %s629_s23  }
 0x145   :  { %625 = dma.done.wait [#allocation4], 4096  }
 0x146   :  { %626 = vsyncadd [#allocation4], 4294963200 }
 0x147   :  { %370 = vsyncpa [#allocation3], 1 }
 0x148   :  { %371 = vsyncpa [#allocation6], 1 }
 0x149   :  { %372 = vsyncpa [#allocation4], 1 }

</bundles_post_ra>
